<compile_context>
chip_gen: v7x
topology: tpu7x:2x2x1
jax: 0.10.0
libtpu: 0.0.40
codegen_flags: <defaults>
</compile_context>

<pallas_src>
import numpy as np
import jax
import jax.numpy as jnp
from jax.experimental import pallas as pl
from jax.experimental.pallas import tpu as pltpu

# ---------------------------------------------------------------------------
# Problem-size constants (small-scale analogue of the paper model)
# ---------------------------------------------------------------------------
H, W = 16, 16            # spatial shape of the stimulus
HW = H * W
KS, KL = 6, 10           # cropped small / large DoG sizes (even, like 134/250)
C = 8                    # number of cells in the population
TRIALS = 1               # trials (hard-coded to 1 in the reference forward)

LANES = 128              # lane-dense padding of the cell axis (matmul N)
SUBLANES = 8             # sublane granularity for the batched M axis
KPAD = 384               # augmented contraction dim: 256 stim + 8 noise + 120 zero (3*128)

# model hyper-parameters (verbatim from the reference forward())
PX_LENGTH = 2.0
NOISE_STD = 0.022
ALPHA = 0.45
BETA = float(np.sqrt(1.0 - ALPHA ** 2))
TAU = 30.0
OFFSET = 0.168


# ---------------------------------------------------------------------------
# Fused Pallas kernel: [conv-at-RF-centre + correlated noise] as ONE MXU matmul
# against the augmented weight, then offset + clip + round on the VPU.
# ---------------------------------------------------------------------------
def _fused_kernel(xz_ref, w_ref, o_ref):
    # xz_ref : (M, KPAD)     rows = [stimulus(256) | z(8) | zeros(120)]
    # w_ref  : (KPAD, LANES) [wmat ; chol(Sigma).T ; 0], cells in cols [0, C)
    # o_ref  : (M, LANES)    lane-dense spike slab
    v = jnp.dot(xz_ref[...], w_ref[...],
                preferred_element_type=jnp.float32,
                precision=jax.lax.Precision.HIGHEST)
    o_ref[...] = jnp.rint(jnp.clip(v + OFFSET, 0.0, 1.0))


def _call_fused(xz, waug):
    m = xz.shape[0]
    return pl.pallas_call(
        _fused_kernel,
        out_shape=jax.ShapeDtypeStruct((m, LANES), jnp.float32),
        in_specs=[pl.BlockSpec(memory_space=pltpu.MemorySpace.VMEM),
                  pl.BlockSpec(memory_space=pltpu.MemorySpace.VMEM)],
        out_specs=pl.BlockSpec(memory_space=pltpu.MemorySpace.VMEM),
    )(xz, waug)


def _forward_single(s, noise_key, waug):
    """Module-faithful hot path: one stimulus, trials=1, one pallas_call."""
    img = s[0, 0, 0].astype(jnp.float32).reshape(TRIALS, HW)          # (1, 256)
    z = jax.random.normal(noise_key, (TRIALS, C), dtype=jnp.float32)  # (1, 8)
    xz = jnp.concatenate(
        [img, z, jnp.zeros((TRIALS, KPAD - HW - C), jnp.float32)], axis=-1)
    out = _call_fused(xz, waug)
    return out[:, :C]                                                 # (trials, cells)


def _forward_batch(stims, noise_key, waug):
    """Batched hot path: N stimuli stacked into the MXU M dimension."""
    n = stims.shape[0]
    m = ((n + SUBLANES - 1) // SUBLANES) * SUBLANES
    imgs = stims.reshape(n, HW).astype(jnp.float32)
    z = jax.random.normal(noise_key, (n, C), dtype=jnp.float32)
    xz = jnp.concatenate(
        [imgs, z, jnp.zeros((n, KPAD - HW - C), jnp.float32)], axis=-1)
    if m != n:
        xz = jnp.concatenate([xz, jnp.zeros((m - n, KPAD), jnp.float32)], axis=0)
    out = _call_fused(xz, waug)
    return out[:n, :C]                                                # (N, cells)


# ---------------------------------------------------------------------------
# One-time setup (host numpy; depends only on the receptive fields)
# ---------------------------------------------------------------------------
def _build_cell_filter_matrix(cells, mask_small, f_small, f_large):
    """Effective per-cell filter W_j such that <W_j, I> equals
    fftconvolve(I, f_sel, mode='same') evaluated at cell j's RF centre.
    scipy 'same' centring offset is (K - 1) // 2 (valid for even K too)."""
    cells = np.asarray(cells, np.int64)
    mask_small = np.asarray(mask_small, bool)
    wmat = np.zeros((HW, C), np.float64)
    for j in range(C):
        f = np.asarray(f_small if mask_small[j] else f_large, np.float64)
        k = f.shape[0]
        off = (k - 1) // 2
        r0 = int(cells[0, j]) + H // 2
        c0 = int(cells[1, j]) + W // 2
        wj = np.zeros((H, W), np.float64)
        for a in range(k):
            for b in range(k):
                p, q = r0 + off - a, c0 + off - b
                if 0 <= p < H and 0 <= q < W:
                    wj[p, q] = f[a, b]
        wmat[:, j] = wj.reshape(-1)
    return wmat


def _build_noise_chol(cells):
    """Cholesky-transpose of the correlated-noise covariance Sigma, so that
    z @ lt has covariance Sigma for z ~ N(0, I)."""
    pos = np.asarray(cells, np.float64) * PX_LENGTH              # (2, C)
    delta = np.linalg.norm(pos[:, :, None] - pos[:, None, :], axis=0)
    sigma = NOISE_STD ** 2 * (BETA * np.exp(-delta / (2.0 * TAU)) + ALPHA * np.eye(C))
    return np.linalg.cholesky(sigma).T                           # (C, C)


class NonnenmacherPallas:
    """Pallas-TPU port of Nonnenmacher_model.  All stimulus-independent work
    (DoG crop, 'same'-conv boundary handling, RF-centre gather, small/large
    mask selection, noise-covariance Cholesky) is folded into one augmented
    constant weight; the per-stimulus path is one jitted fn with one
    pallas_call containing a single MXU matmul + elementwise epilogue."""

    def __init__(self, cells, mask_small, f_dog_small, f_dog_large):
        # central crops of the stored DoG filters (analogue of [133:267]/[75:325])
        f_s_full = np.asarray(f_dog_small, np.float64)
        f_l_full = np.asarray(f_dog_large, np.float64)
        cs0 = (f_s_full.shape[0] - KS) // 2
        cl0 = (f_l_full.shape[0] - KL) // 2
        f_s = f_s_full[cs0:cs0 + KS, cs0:cs0 + KS]
        f_l = f_l_full[cl0:cl0 + KL, cl0:cl0 + KL]

        wmat = _build_cell_filter_matrix(cells, mask_small, f_s, f_l)   # (HW, C)
        lt = _build_noise_chol(cells)                                   # (C, C)

        waug = np.zeros((KPAD, LANES), np.float32)
        waug[:HW, :C] = wmat.astype(np.float32)
        waug[HW:HW + C, :C] = lt.astype(np.float32)
        self._waug = jnp.asarray(waug)

        self._fwd = jax.jit(_forward_single)
        self._fwd_batch = jax.jit(_forward_batch)

    def __call__(self, s, noise_key):
        # TODO(synk): noise is a deterministic jax.random Cholesky draw; it is
        # distributionally equal to np.random.multivariate_normal but not
        # bitwise reproducible against the reference's global numpy RNG.
        return self._fwd(s, noise_key, self._waug)

    def forward_batch(self, stims, noise_key):
        """Extra (non-reference) API: evaluate N stimuli (N, H, W) in one call,
        amortizing the per-call launch overhead across the MXU M rows."""
        return self._fwd_batch(stims, noise_key, self._waug)


# ---------------------------------------------------------------------------
# Deterministic synthetic inputs + pure-numpy reference check
# ---------------------------------------------------------------------------
def _make_dog(size, sigma1, sigma2):
    ax = np.arange(size, dtype=np.float64) - (size - 1) / 2.0
    xx, yy = np.meshgrid(ax, ax, indexing="ij")
    g1 = np.exp(-(xx ** 2 + yy ** 2) / (2 * sigma1 ** 2)); g1 /= g1.sum()
    g2 = np.exp(-(xx ** 2 + yy ** 2) / (2 * sigma2 ** 2)); g2 /= g2.sum()
    return (g1 - g2).astype(np.float32)


def _ref_conv_at_cells(img, cells, mask_small, f_s, f_l):
    """Direct numpy 'same'-mode conv evaluated only at the RF centres."""
    vals = np.zeros(C, np.float64)
    for j in range(C):
        f = f_s if mask_small[j] else f_l
        k = f.shape[0]
        off = (k - 1) // 2
        r0 = int(cells[0, j]) + H // 2
        c0 = int(cells[1, j]) + W // 2
        v = 0.0
        for a in range(k):
            for b in range(k):
                p, q = r0 + off - a, c0 + off - b
                if 0 <= p < H and 0 <= q < W:
                    v += img[p, q] * f[a, b]
        vals[j] = v
    return vals


if __name__ == "__main__":
    key = jax.random.PRNGKey(0)
    k_cells, k_stim, k_noise, k_batch_stim, k_batch_noise = jax.random.split(key, 5)

    # deterministic synthetic "receptive_fields" tuple contents
    cells = np.asarray(jax.random.randint(k_cells, (2, C), -H // 2, H // 2))
    mask_small = np.array([True, False, True, True, False, True, False, False])
    f_dog_small = _make_dog(12, 1.0, 2.5)
    f_dog_large = _make_dog(20, 2.0, 5.0)

    model = NonnenmacherPallas(cells, mask_small, f_dog_small, f_dog_large)

    # host-side copies of the folded constants for the reference
    cs0 = (f_dog_small.shape[0] - KS) // 2
    cl0 = (f_dog_large.shape[0] - KL) // 2
    f_s_ref = np.asarray(f_dog_small, np.float64)[cs0:cs0 + KS, cs0:cs0 + KS]
    f_l_ref = np.asarray(f_dog_large, np.float64)[cl0:cl0 + KL, cl0:cl0 + KL]
    lt_ref = _build_noise_chol(cells)                                   # (C, C) f64

    # ------------------- single-stimulus (module-faithful) path -------------
    s = jax.random.normal(k_stim, (1, 1, 1, H, W), dtype=jnp.float32)
    out = jax.block_until_ready(model(s, k_noise))
    out_np = np.asarray(out)

    I_np = np.asarray(s[0, 0, 0], np.float64)
    z_ref = np.asarray(jax.random.normal(k_noise, (TRIALS, C), dtype=jnp.float32),
                       np.float64)
    noise_ref = z_ref @ lt_ref
    conv_ref = _ref_conv_at_cells(I_np, cells, mask_small, f_s_ref, f_l_ref)
    x_ref = np.clip(conv_ref[None, :] + noise_ref + OFFSET, 0.0, 1.0)
    b_ref = np.rint(x_ref)

    assert out_np.shape == (TRIALS, C)
    assert np.all(np.isfinite(out_np))
    assert np.all((out_np == 0.0) | (out_np == 1.0))
    safe = np.abs(x_ref - 0.5) > 5e-3       # guard f32-vs-f64 near the threshold
    assert np.array_equal(out_np[safe], b_ref[safe])

    # ------------------- batched path (perf lever; N stimuli per call) ------
    NB = 5
    stims = jax.random.normal(k_batch_stim, (NB, H, W), dtype=jnp.float32)
    out_b = jax.block_until_ready(model.forward_batch(stims, k_batch_noise))
    out_b_np = np.asarray(out_b)

    z_b = np.asarray(jax.random.normal(k_batch_noise, (NB, C), dtype=jnp.float32),
                     np.float64)
    noise_b = z_b @ lt_ref
    stims_np = np.asarray(stims, np.float64)
    conv_b = np.stack([_ref_conv_at_cells(stims_np[i], cells, mask_small,
                                          f_s_ref, f_l_ref) for i in range(NB)])
    x_b_ref = np.clip(conv_b + noise_b + OFFSET, 0.0, 1.0)
    b_b_ref = np.rint(x_b_ref)

    assert out_b_np.shape == (NB, C)
    assert np.all((out_b_np == 0.0) | (out_b_np == 1.0))
    safe_b = np.abs(x_b_ref - 0.5) > 5e-3
    assert np.array_equal(out_b_np[safe_b], b_b_ref[safe_b])

    print("KERNEL_OK")
</pallas_src>

<mosaic_0001>
module attributes {stable_mosaic.version = 11 : i64} {
  func.func @_fused_kernel(%arg0: memref<1x384xf32, #tpu.memory_space<vmem>>, %arg1: memref<384x128xf32, #tpu.memory_space<vmem>>, %arg2: memref<1x128xf32, #tpu.memory_space<vmem>>) attributes {dimension_semantics = [], scalar_prefetch = 0 : i64, scratch_operands = 0 : i64, tpu.core_type = #tpu.core_type<tc>} {
    %c0 = arith.constant 0 : index
    %c0_0 = arith.constant 0 : index
    %0 = vector.load %arg0[%c0, %c0_0] : memref<1x384xf32, #tpu.memory_space<vmem>>, vector<1x384xf32>
    %c0_1 = arith.constant 0 : index
    %c0_2 = arith.constant 0 : index
    %1 = vector.load %arg1[%c0_1, %c0_2] : memref<384x128xf32, #tpu.memory_space<vmem>>, vector<384x128xf32>
    %cst = arith.constant dense<0.000000e+00> : vector<1x128xf32>
    %2 = tpu.matmul %0, %1, %cst {dimension_numbers = #tpu.dot_dimension_numbers<[1], [0], [0], [1], [0, 0, 1, 1], [], []>, precision = #tpu.contract_precision<fp32>} : vector<1x384xf32>, vector<384x128xf32>, vector<1x128xf32> -> vector<1x128xf32>
    %cst_3 = arith.constant 1.680000e-01 : f32
    %3 = vector.broadcast %cst_3 : f32 to vector<1x128xf32>
    %4 = arith.addf %2, %3 : vector<1x128xf32>
    %cst_4 = arith.constant 0.000000e+00 : f32
    %cst_5 = arith.constant 1.000000e+00 : f32
    %5 = vector.broadcast %cst_4 : f32 to vector<1x128xf32>
    %6 = arith.maximumf %5, %4 : vector<1x128xf32>
    %7 = vector.broadcast %cst_5 : f32 to vector<1x128xf32>
    %8 = arith.minimumf %7, %6 : vector<1x128xf32>
    %9 = math.roundeven %8 : vector<1x128xf32>
    %c0_6 = arith.constant 0 : index
    %c0_7 = arith.constant 0 : index
    %10 = vector.load %arg2[%c0_6, %c0_7] : memref<1x128xf32, #tpu.memory_space<vmem>>, vector<1x128xf32>
    tpu.vector_store %arg2[%c0_6, %c0_7], %9 {strides = array<i32>} : memref<1x128xf32, #tpu.memory_space<vmem>>, vector<1x128xf32>,
    return
  }
}

</mosaic_0001>

<bundles_post_ra>
// kernel: squeeze.5
= control target key start
LH: loop header
LB: loop body
LE: loop exit
PB: predicated region body
PF: predicated region fallthrough
CT: control target
= control target key end

     0   :  { %2 = vsyncpa [#allocation1], 0  ;;  %s110_s6 = smov [#allocation0]   ;;  %s146_s0 = inlined_call_operand.hbm [shape: f32[1,1,1,16,16], index: 0, kind: input, shape index: {}]   ;;  %s147_s1 = inlined_call_operand.vmem [shape: f32[1,256], index: 1, kind: output, shape index: {}]  }
   0x1   :  { %s7_s7 = sshll.u32 %s110_s6, 4  ;;  %s86_s10 = scalar_lea.hbm %s146_s0, 256  ;;  %s8_s7 = int_to_ptr.vmem [resolvable:$true] %s7_s7 }
   0x2   :  { %p87_p0 = scmp.ne.s32.totalorder %s146_s0, %s86_s10  ;;  %p90_p1 = scmp.lt.u32.totalorder %s86_s10, %s146_s0 }
   0x4   :  { %p92_p2 = pnand %p90_p1, %p87_p0 }
   0x6   :  { %95 = shalt.err (!%p92_p2)
}
   0x7   :  { %s96_s15 = scalar_lea.vmem %s8_s7, 256  ;;  %p101_p4 = scmp.lt.s32.totalorder %s8_s7, %s8_s7 }
   0x8   :  { %p97_p3 = scmp.ne.s32.totalorder %s8_s7, %s96_s15  ;;  %p102_p5 = scmp.lt.s32.totalorder %s96_s15, %s96_s15 }
   0xa   :  { %p103_p6 = por %p102_p5, %p101_p4 }
   0xc   :  { %p104_p7 = pnand %p103_p6, %p97_p3 }
   0xe   :  { %107 = shalt.err (!%p104_p7)
}
   0xf   :  { %10 = dma.hbm_to_vmem [thread:$0]  %s146_s0, 256, %s8_s7, [#allocation1]  }
  0x10   :  { %108 = dma.done.wait [#allocation1], 256  }
  0x11   :  { %109 = vsyncadd [#allocation1], 4294967040  ;;  %s17_s0 = smov 3  ;;  %s31_s18 = smov 3  ;;  %vm14_vm0 = vcmask 130048   ;;  %vm21_vm1 = vcmask 1048448  }
  0x12   :  { %s24_s19 = smov 3  ;;  %s38_s20 = smov 3  ;;  %v18_v0 = vld [vmem:[#allocation0 + $0x7] ss:$8 sm:%s17_s0]   ;;  %v32_v1 = vld [vmem:[#allocation0 + $0x5] ss:$8 sm:%s31_s18]  }
  0x13   :  { %s111_s21 = smov 112   ;;  %s112_s22 = smov 80   ;;  %v25_v2 = vld [vmem:[#allocation0 + $0x6] ss:$8 sm:%s24_s19]   ;;  %v39_v3 = vld [vmem:[#allocation0 + $0x4] ss:$8 sm:%s38_s20]  }
  0x14   :  { %19 = vrot.lane.b32.xlu0 %v18_v0, %s111_s21  ;;  %33 = vrot.lane.b32.xlu1 %v32_v1, %s112_s22  ;;  %s12_s23 = smov 3  ;;  %s45_s24 = smov 3  ;;  %vm28_vm2 = vcmask 917248   ;;  %vm35_vm3 = vcmask 786048   ;;  %vm42_vm4 = vcmask 654848   ;;  %vm49_vm5 = vcmask 523648  }
  0x15   :  { %v13_v4 = vld [vmem:[#allocation0] ss:$8 sm:%s12_s23]   ;;  %s52_s25 = smov 3  ;;  %s113_s26 = smov 96   ;;  %v46_v5 = vld [vmem:[#allocation0 + $0x3] ss:$8 sm:%s45_s24]  }
  0x16   :  { %15 = vst.msk [vmem:[#allocation2] ss:$8 sm:$0x3] %vm14_vm0, %v13_v4   ;;  %s114_s27 = smov 64   ;;  %v53_v6 = vld [vmem:[#allocation0 + $0x2] ss:$8 sm:%s52_s25]  }
  0x17   :  { %s59_s28 = smov 3  ;;  %s115_s29 = smov 48   ;;  %vm56_vm6 = vcmask 392448   ;;  %vm63_vm7 = vcmask 261248  }
  0x18   :  { %26 = vrot.lane.b32.xlu0 %v25_v2, %s113_s26  ;;  %40 = vrot.lane.b32.xlu1 %v39_v3, %s114_s27  ;;  %s116_s30 = smov 32   ;;  %v60_v7 = vld [vmem:[#allocation0 + $0x1] ss:$8 sm:%s59_s28]   ;;  %s117_s2 = smov 16  }
  0x1c   :  { %47 = vrot.lane.b32.xlu0 %v46_v5, %s115_s29  ;;  %54 = vrot.lane.b32.xlu1 %v53_v6, %s116_s30 }
  0x20   :  { %61 = vrot.lane.b32.xlu0 %v60_v7, %s117_s2 }
  0x86   :  { %v20_v8 = vpop.permute.xlu0 %19   ;;  %v34_v9 = vpop.permute.xlu1 %33  }
  0x87   :  { %22 = vst.msk [vmem:[#allocation2] ss:$8 sm:$0x3] %vm21_vm1, %v20_v8  }
  0x8a   :  { %v27_v10 = vpop.permute.xlu0 %26   ;;  %v41_v11 = vpop.permute.xlu1 %40  }
  0x8b   :  { %29 = vst.msk [vmem:[#allocation2] ss:$8 sm:$0x3] %vm28_vm2, %v27_v10  }
  0x8c   :  { %36 = vst.msk [vmem:[#allocation2] ss:$8 sm:$0x3] %vm35_vm3, %v34_v9  }
  0x8d   :  { %43 = vst.msk [vmem:[#allocation2] ss:$8 sm:$0x3] %vm42_vm4, %v41_v11  }
  0x8e   :  { %v48_v12 = vpop.permute.xlu0 %47   ;;  %v55_v13 = vpop.permute.xlu1 %54  }
  0x8f   :  { %50 = vst.msk [vmem:[#allocation2] ss:$8 sm:$0x3] %vm49_vm5, %v48_v12  }
  0x90   :  { %57 = vst.msk [vmem:[#allocation2] ss:$8 sm:$0x3] %vm56_vm6, %v55_v13  }
  0x92   :  { %v62_v14 = vpop.permute.xlu0 %61  }
  0x93   :  { %64 = vst.msk [vmem:[#allocation2] ss:$8 sm:$0x3] %vm63_vm7, %v62_v14  }
  0x9a   :  { %v68_v15 = vld [vmem:[#allocation2] sm:$0x1]  ;;  %v72_v16 = vld [vmem:[#allocation2 + $0x8] sm:$0x1] }
  0x9b   :  { %70 = vst [vmem:[%s147_s1] sm:$0x1] %v68_v15  ;;  %77 = vst [vmem:[%s147_s1 + $0x1] sm:$0x1] %v72_v16 }
  0x9c   :  { %76 = vsyncpa [#allocation1], 1 }

// kernel: _forward_single.1
= control target key start
LH: loop header
LB: loop body
LE: loop exit
PB: predicated region body
PF: predicated region fallthrough
CT: control target
= control target key end

     0   :  { %7 = vsyncpa [#allocation3], 0  ;;  %s3327_s0 = inlined_call_operand.vmem [shape: f32[1,384], index: 0, kind: input, shape index: {}]   ;;  %s3328_s1 = inlined_call_operand.hbm [shape: f32[384,128], index: 1, kind: input, shape index: {}]   ;;  %s3329_s2 = inlined_call_operand.hbm [shape: f32[1,128], index: 2, kind: output, shape index: {}]  }
   0x1   :  { %8 = vsyncpa [#allocation4], 0  ;;  %s2538_s9 = smov [#allocation2]   ;;  %s2490_s13 = scalar_lea.hbm %s3328_s1, 6144 }
   0x2   :  { %s16_s10 = sshll.u32 %s2538_s9, 4  ;;  %p2491_p0 = scmp.ne.s32.totalorder %s3328_s1, %s2490_s13  ;;  %s17_s10 = int_to_ptr.vmem [resolvable:$true] %s16_s10 }
   0x3   :  { %p2494_p1 = scmp.lt.u32.totalorder %s2490_s13, %s3328_s1 }
   0x5   :  { %p2496_p2 = pnand %p2494_p1, %p2491_p0 }
   0x7   :  { %2499 = shalt.err (!%p2496_p2)
}
   0x8   :  { %s2500_s18 = scalar_lea.vmem %s17_s10, 6144  ;;  %p2505_p4 = scmp.lt.s32.totalorder %s17_s10, %s17_s10 }
   0x9   :  { %p2501_p3 = scmp.ne.s32.totalorder %s17_s10, %s2500_s18  ;;  %p2506_p5 = scmp.lt.s32.totalorder %s2500_s18, %s2500_s18 }
   0xb   :  { %p2507_p6 = por %p2506_p5, %p2505_p4 }
   0xd   :  { %p2508_p7 = pnand %p2507_p6, %p2501_p3 }
   0xf   :  { %2511 = shalt.err (!%p2508_p7)
}
  0x10   :  { %s2539_s19 = smov 128   ;;  %s2540_s20 = smov 8  }
  0x11   :  { %22 = dma.hbm_to_vmem [thread:$0]  %s3328_s1, 6144, %s17_s10, [#allocation3], %s2539_s19, %s2539_s19, %s2540_s20  }
  0x12   :  { %2534 = dma.done.wait [#allocation3], 6144  }
  0x13   :  { %2535 = vsyncadd [#allocation3], 4294961152  ;;  %v76_v0 = vlaneseq  ;;  %v3338_v1 = vmov 0.0|0.0   ;;  %vm2542_vm0 = vmmov 0   ;;  %v3330_v2 = vmov 0.0   ;;  %v43_v4 = vld [vmem:[#allocation2 + $0x80] sm:$0xff] }
  0x14   :  { %2327 = vmatprep.subr.bf16.mxu0 %v3338_v1  ;;  %1957 = vmatprep.mubr.msk.f32.mxu0 %vm2542_vm0, %v3330_v2  ;;  %v44_v5 = vld [vmem:[#allocation2 + $0x88] sm:$0xff]  ;;  %v59_v6 = vld [vmem:[#allocation2 + $0x100] sm:$0xff]  ;;  %v140_v10 = vand.u32 4294901760, %v43_v4  ;;  %v45_v19 = vld [vmem:[#allocation2 + $0x90] sm:$0xff] }
  0x15   :  { %v2575_v3 = vshrl.u32 %v76_v0, 7  ;;  %v143_v11 = vand.u32 4294901760, %v44_v5  ;;  %v60_v12 = vld [vmem:[#allocation2 + $0x108] sm:$0xff]  ;;  %v954_v13 = vand.u32 4294901760, %v59_v6  ;;  %v27_v14 = vld [vmem:[#allocation2] sm:$0xff]  ;;  %v46_v20 = vld [vmem:[#allocation2 + $0x98] sm:$0xff] }
  0x16   :  { %v28_v15 = vld [vmem:[#allocation2 + $0x8] sm:$0xff]  ;;  %v957_v16 = vand.u32 4294901760, %v60_v12  ;;  %v92_v17 = vand.u32 4294901760, %v27_v14  ;;  %v61_v21 = vld [vmem:[#allocation2 + $0x110] sm:$0xff]  ;;  %v2582_v23 = vsub.f32 %v43_v4, %v140_v10  ;;  %v62_v26 = vld [vmem:[#allocation2 + $0x118] sm:$0xff]  ;;  %v146_v35 = vand.u32 4294901760, %v45_v19 }
  0x17   :  { %v95_v18 = vand.u32 4294901760, %v28_v15  ;;  %v2580_v22 = vpack.c.bf16 %v143_v11, %v140_v10  ;;  %v2584_v24 = vsub.f32 %v44_v5, %v143_v11  ;;  %v2586_v25 = vsub.f32 %v59_v6, %v954_v13  ;;  %v29_v27 = vld [vmem:[#allocation2 + $0x10] sm:$0xff]  ;;  %v30_v28 = vld [vmem:[#allocation2 + $0x18] sm:$0xff]  ;;  %v47_v33 = vld [vmem:[#allocation2 + $0xa0] sm:$0xff] }
  0x18   :  { %v2588_v29 = vpack.c.bf16 %v957_v16, %v954_v13  ;;  %v2590_v30 = vsub.f32 %v60_v12, %v957_v16  ;;  %v2594_v32 = vsub.f32 %v27_v14, %v92_v17  ;;  %v149_v36 = vand.u32 4294901760, %v46_v20  ;;  %v48_v38 = vld [vmem:[#allocation2 + $0xa8] sm:$0xff]  ;;  %v63_v43 = vld [vmem:[#allocation2 + $0x120] sm:$0xff]  ;;  %v49_v51 = vld [vmem:[#allocation2 + $0xb0] sm:$0xff] }
  0x19   :  { %3463 = vst [vmem:[#allocation8_spill] sm:$0xff] %v2580_v22  ;;  %3464 = vst [vmem:[#allocation9_spill] sm:$0xff] %v2584_v24  ;;  %v2592_v31 = vpack.c.bf16 %v95_v18, %v92_v17  ;;  %2136 = vmatprep.subr.bf16.mxu1 %v2580_v22  ;;  %v2597_v34 = vsub.f32 %v28_v15, %v95_v18  ;;  %v960_v37 = vand.u32 4294901760, %v61_v21  ;;  %v963_v39 = vand.u32 4294901760, %v62_v26  ;;  %v64_v44 = vld [vmem:[#allocation2 + $0x128] sm:$0xff]  ;;  %v31_v49 = vld [vmem:[#allocation2 + $0x20] sm:$0xff] }
  0x1a   :  { %3465 = vst [vmem:[#allocation10_spill] sm:$0xff] %v2586_v25  ;;  %3466 = vst [vmem:[#allocation11_spill] sm:$0xff] %v2588_v29  ;;  %2329 = vmatpush3.bf16.msra.mxu0 %v2588_v29  ;;  %v98_v40 = vand.u32 4294901760, %v29_v27  ;;  %v101_v41 = vand.u32 4294901760, %v30_v28  ;;  %v152_v42 = vand.u32 4294901760, %v47_v33  ;;  %v2602_v45 = vpack.c.bf16 %v149_v36, %v146_v35  ;;  %v32_v50 = vld [vmem:[#allocation2 + $0x28] sm:$0xff] }
  0x1b   :  { %3467 = vst [vmem:[#allocation12_spill] sm:$0xff] %v2590_v30  ;;  %3468 = vst [vmem:[#allocation13_spill] sm:$0xff] %v2592_v31  ;;  %2138 = vmatpush3.bf16.msra.mxu1 %v2592_v31  ;;  %2330 = vmatprep.subr.bf16.mxu0 %v3338_v1  ;;  %v2604_v46 = vsub.f32 %v45_v19, %v146_v35  ;;  %v2606_v47 = vsub.f32 %v46_v20, %v149_v36  ;;  %v50_v56 = vld [vmem:[#allocation2 + $0xb8] sm:$0xff]  ;;  %v155_v58 = vand.u32 4294901760, %v48_v38  ;;  %v65_v4 = vld [vmem:[#allocation2 + $0x130] sm:$0xff] }
  0x1c   :  { %3469 = vst [vmem:[#allocation14_spill] sm:$0xff] %v2594_v32  ;;  %3470 = vst [vmem:[#allocation15_spill] sm:$0xff] %v2602_v45  ;;  %v2608_v48 = vsub.f32 %v61_v21, %v960_v37  ;;  %v2610_v52 = vpack.c.bf16 %v963_v39, %v960_v37  ;;  %v2612_v53 = vsub.f32 %v62_v26, %v963_v39  ;;  %2140 = vmatprep.subr.bf16.mxu1 %v2602_v45  ;;  %v66_v5 = vld [vmem:[#allocation2 + $0x138] sm:$0xff]  ;;  %v33_v13 = vld [vmem:[#allocation2 + $0x30] sm:$0xff] }
  0x1d   :  { %v2614_v54 = vpack.c.bf16 %v101_v41, %v98_v40  ;;  %v2616_v55 = vsub.f32 %v29_v27, %v98_v40  ;;  %v2619_v57 = vsub.f32 %v30_v28, %v101_v41  ;;  %v2621_v59 = vsub.f32 %v47_v33, %v152_v42  ;;  %v34_v14 = vld [vmem:[#allocation2 + $0x38] sm:$0xff]  ;;  %v51_v15 = vld [vmem:[#allocation2 + $0xc0] sm:$0xff]  ;;  %v52_v20 = vld [vmem:[#allocation2 + $0xc8] sm:$0xff] }
  0x1e   :  { %3471 = vst [vmem:[#allocation16_spill] sm:$0xff] %v2610_v52  ;;  %v966_v60 = vand.u32 4294901760, %v63_v43  ;;  %2332 = vmatpush3.bf16.msra.mxu0 %v2610_v52  ;;  %v969_v61 = vand.u32 4294901760, %v64_v44  ;;  %v104_v62 = vand.u32 4294901760, %v31_v49  ;;  %v107_v63 = vand.u32 4294901760, %v32_v50  ;;  %v67_v21 = vld [vmem:[#allocation2 + $0x140] sm:$0xff] }
  0x1f   :  { %3472 = vst [vmem:[#allocation17_spill] sm:$0xff] %v2614_v54  ;;  %2142 = vmatpush3.bf16.msra.mxu1 %v2614_v54  ;;  %v158_v0 = vand.u32 4294901760, %v49_v51  ;;  %2333 = vmatprep.subr.bf16.mxu0 %v3338_v1  ;;  %v2626_v6 = vpack.c.bf16 %v155_v58, %v152_v42  ;;  %v2628_v10 = vsub.f32 %v48_v38, %v155_v58  ;;  %v161_v12 = vand.u32 4294901760, %v50_v56  ;;  %v68_v26 = vld [vmem:[#allocation2 + $0x148] sm:$0xff]  ;;  %v69_v2 = vld [vmem:[#allocation2 + $0x150] sm:$0xff]  ;;  %v70_v9 = vld [vmem:[#allocation2 + $0x158] sm:$0xff] }
  0x20   :  { %v2630_v11 = vsub.f32 %v63_v43, %v966_v60  ;;  %v2632_v16 = vpack.c.bf16 %v969_v61, %v966_v60  ;;  %v2634_v17 = vsub.f32 %v64_v44, %v969_v61  ;;  %v2636_v18 = vpack.c.bf16 %v107_v63, %v104_v62  ;;  %v35_v44 = vld [vmem:[#allocation2 + $0x40] sm:$0xff]  ;;  %v36_v58 = vld [vmem:[#allocation2 + $0x48] sm:$0xff]  ;;  %v53_v60 = vld [vmem:[#allocation2 + $0xd0] sm:$0xff] }
  0x21   :  { %3473 = vst [vmem:[#allocation18_spill] sm:$0xff] %v2626_v6  ;;  %v2638_v19 = vsub.f32 %v31_v49, %v104_v62  ;;  %2144 = vmatprep.subr.bf16.mxu1 %v2626_v6  ;;  %v2641_v27 = vsub.f32 %v32_v50, %v107_v63  ;;  %v2643_v28 = vpack.c.bf16 %v161_v12, %v158_v0  ;;  %v972_v36 = vand.u32 4294901760, %v65_v4  ;;  %v54_v61 = vld [vmem:[#allocation2 + $0xd8] sm:$0xff]  ;;  %v37_v8 = vld [vmem:[#allocation2 + $0x50] sm:$0xff] }
  0x22   :  { %3474 = vst [vmem:[#allocation19_spill] sm:$0xff] %v2632_v16  ;;  %3475 = vst [vmem:[#allocation20_spill] sm:$0xff] %v2636_v18  ;;  %v2645_v33 = vsub.f32 %v49_v51, %v158_v0  ;;  %v2647_v35 = vsub.f32 %v50_v56, %v161_v12  ;;  %2335 = vmatpush3.bf16.msra.mxu0 %v2632_v16  ;;  %v975_v37 = vand.u32 4294901760, %v66_v5  ;;  %v110_v38 = vand.u32 4294901760, %v33_v13  ;;  %v57_v45 = vld [vmem:[#allocation2 + $0xf0] sm:$0xff]  ;;  %v74_v31 = vld [vmem:[#allocation2 + $0x178] sm:$0xff] }
  0x23   :  { %3476 = vst [vmem:[#allocation21_spill] sm:$0xff] %v2643_v28  ;;  %2146 = vmatpush3.bf16.msra.mxu1 %v2636_v18  ;;  %v113_v39 = vand.u32 4294901760, %v34_v14  ;;  %2336 = vmatprep.subr.bf16.mxu0 %v3338_v1  ;;  %v164_v40 = vand.u32 4294901760, %v51_v15  ;;  %v167_v41 = vand.u32 4294901760, %v52_v20  ;;  %v978_v42 = vand.u32 4294901760, %v67_v21  ;;  %v40_v18 = vld [vmem:[#allocation2 + $0x68] sm:$0xff] }
  0x24   :  { %2148 = vmatprep.subr.bf16.mxu1 %v2643_v28  ;;  %v981_v43 = vand.u32 4294901760, %v68_v26  ;;  %v2653_v49 = vpack.c.bf16 %v975_v37, %v972_v36  ;;  %v2655_v50 = vsub.f32 %v65_v4, %v972_v36  ;;  %v2657_v51 = vsub.f32 %v66_v5, %v975_v37  ;;  %v41_v29 = vld [vmem:[#allocation2 + $0x70] sm:$0xff] }
  0x25   :  { %v2659_v56 = vpack.c.bf16 %v113_v39, %v110_v38  ;;  %v2661_v62 = vsub.f32 %v33_v13, %v110_v38  ;;  %v2663_v63 = vsub.f32 %v34_v14, %v113_v39  ;;  %v2665_v0 = vpack.c.bf16 %v167_v41, %v164_v40  ;;  %v38_v39 = vld [vmem:[#allocation2 + $0x58] sm:$0xff] }
  0x26   :  { %3477 = vst [vmem:[#allocation22_spill] sm:$0xff] %v2653_v49  ;;  %v2667_v12 = vsub.f32 %v51_v15, %v164_v40  ;;  %2338 = vmatpush3.bf16.msra.mxu0 %v2653_v49  ;;  %v2671_v4 = vsub.f32 %v52_v20, %v167_v41  ;;  %v2673_v5 = vpack.c.bf16 %v981_v43, %v978_v42  ;;  %v116_v13 = vand.u32 4294901760, %v35_v44  ;;  %v56_v49 = vld [vmem:[#allocation2 + $0xe8] sm:$0xff] }
  0x27   :  { %3478 = vst [vmem:[#allocation23_spill] sm:$0xff] %v2659_v56  ;;  %3479 = vst [vmem:[#allocation24_spill] sm:$0xff] %v2665_v0  ;;  %2150 = vmatpush3.bf16.msra.mxu1 %v2659_v56  ;;  %v2675_v36 = vsub.f32 %v67_v21, %v978_v42  ;;  %2339 = vmatprep.subr.bf16.mxu0 %v3338_v1  ;;  %v2679_v14 = vsub.f32 %v68_v26, %v981_v43  ;;  %v119_v15 = vand.u32 4294901760, %v36_v58  ;;  %v55_v56 = vld [vmem:[#allocation2 + $0xe0] sm:$0xff]  ;;  %v72_v43 = vld [vmem:[#allocation2 + $0x168] sm:$0xff] }
  0x28   :  { %3480 = vst [vmem:[#allocation25_spill] sm:$0xff] %v2673_v5  ;;  %2152 = vmatprep.subr.bf16.mxu1 %v2665_v0  ;;  %v170_v37 = vand.u32 4294901760, %v53_v60  ;;  %v173_v38 = vand.u32 4294901760, %v54_v61  ;;  %v2681_v40 = vsub.f32 %v35_v44, %v116_v13  ;;  %v984_v7 = vand.u32 4294901760, %v69_v2  ;;  %v71_v21 = vld [vmem:[#allocation2 + $0x160] sm:$0xff] }
  0x29   :  { %v987_v20 = vand.u32 4294901760, %v70_v9  ;;  %v122_v41 = vand.u32 4294901760, %v37_v8  ;;  %v2683_v42 = vpack.c.bf16 %v119_v15, %v116_v13  ;;  %v2685_v28 = vsub.f32 %v36_v58, %v119_v15  ;;  %v39_v0 = vld [vmem:[#allocation2 + $0x60] sm:$0xff] }
  0x2a   :  { %v2687_v1 = vpack.c.bf16 %v173_v38, %v170_v37  ;;  %v2689_v26 = vsub.f32 %v53_v60, %v170_v37  ;;  %2341 = vmatpush3.bf16.msra.mxu0 %v2673_v5  ;;  %v2692_v44 = vsub.f32 %v54_v61, %v173_v38  ;;  %v2696_v6 = vsub.f32 %v69_v2, %v984_v7  ;;  %v58_v2 = vld [vmem:[#allocation2 + $0xf8] sm:$0xff] }
  0x2b   :  { %3481 = vst [vmem:[#allocation26_spill] sm:$0xff] %v2683_v42  ;;  %v2694_v16 = vpack.c.bf16 %v987_v20, %v984_v7  ;;  %v2698_v54 = vsub.f32 %v70_v9, %v987_v20  ;;  %2154 = vmatpush3.bf16.msra.mxu1 %v2683_v42  ;;  %v3485_v58 = vmov 0.0|0.0   ;;  %v125_v13 = vand.u32 4294901760, %v38_v39 }
  0x2c   :  { %3482 = vst [vmem:[#allocation27_spill] sm:$0xff] %v2687_v1  ;;  %2342 = vmatprep.subr.bf16.mxu0 %v3485_v58  ;;  %v2702_v60 = vsub.f32 %v37_v8, %v122_v41  ;;  %v176_v15 = vand.u32 4294901760, %v55_v56  ;;  %v179_v37 = vand.u32 4294901760, %v56_v49  ;;  %2156 = vmatprep.subr.bf16.mxu1 %v2687_v1  ;;  %v990_v5 = vand.u32 4294901760, %v71_v21  ;;  %v73_v8 = vld [vmem:[#allocation2 + $0x170] sm:$0xff] }
  0x2d   :  { %3483 = vst [vmem:[#allocation28_spill] sm:$0xff] %v2694_v16  ;;  %3484 = vst [vmem:[#allocation29_spill] sm:$0xff] %v2698_v54  ;;  %v993_v61 = vand.u32 4294901760, %v72_v43  ;;  %v128_v38 = vand.u32 4294901760, %v39_v0  ;;  %v131_v52 = vand.u32 4294901760, %v40_v18  ;;  %v2705_v7 = vpack.c.bf16 %v125_v13, %v122_v41  ;;  %v42_v41 = vld [vmem:[#allocation2 + $0x78] sm:$0xff] }
  0x2e   :  { %3486 = vst [vmem:[#allocation30_spill] sm:$0xff] %v2702_v60  ;;  %v2707_v9 = vsub.f32 %v38_v39, %v125_v13  ;;  %v2709_v20 = vpack.c.bf16 %v179_v37, %v176_v15  ;;  %v2711_v42 = vsub.f32 %v55_v56, %v176_v15  ;;  %2344 = vmatpush3.bf16.msra.mxu0 %v2694_v16  ;;  %v26_v39 = vld [vmem:[%s3327_s0] sm:$0x7]  ;;  %v182_v15 = vand.u32 4294901760, %v57_v45  ;;  %s2544_s0 = smov [#allocation5]  }
  0x2f   :  { %3487 = vst [vmem:[#allocation31_spill] sm:$0xff] %v2705_v7  ;;  %v2714_v1 = vsub.f32 %v56_v49, %v179_v37  ;;  %v2716_v22 = vpack.c.bf16 %v993_v61, %v990_v5  ;;  %v2718_v60 = vsub.f32 %v71_v21, %v990_v5  ;;  %v2720_v54 = vsub.f32 %v72_v43, %v993_v61  ;;  %s1604_s24 = sshll.u32 %s2544_s0, 4  ;;  %s1605_s24 = int_to_ptr.vmem [resolvable:$true] %s1604_s24 }
  0x30   :  { %3488 = vst [vmem:[#allocation32_spill] sm:$0xff] %v2709_v20  ;;  %2158 = vmatpush3.bf16.msra.mxu1 %v2705_v7  ;;  %2345 = vmatprep.subr.bf16.mxu0 %v3485_v58  ;;  %v2727_v56 = vpack.c.bf16 %v131_v52, %v128_v38  ;;  %v2729_v13 = vsub.f32 %v39_v0, %v128_v38  ;;  %v185_v5 = vand.u32 4294901760, %v58_v2  ;;  %v996_v21 = vand.u32 4294901760, %v73_v8  ;;  %s2512_s25 = scalar_lea.vmem %s1605_s24, 16  ;;  %s2516_s26 = scalar_lea.vmem %s1605_s24, 32 }
  0x31   :  { %3489 = vst [vmem:[#allocation33_spill] sm:$0xff] %v2714_v1  ;;  %3490 = vst [vmem:[#allocation34_spill] sm:$0xff] %v2716_v22  ;;  %v2731_v49 = vsub.f32 %v40_v18, %v131_v52  ;;  %2160 = vmatprep.subr.bf16.mxu1 %v2709_v20  ;;  %v999_v43 = vand.u32 4294901760, %v74_v31  ;;  %v134_v37 = vand.u32 4294901760, %v41_v29  ;;  %v2734_v61 = vsub.f32 %v57_v45, %v182_v15  ;;  %p2513_p8 = scmp.ne.s32.totalorder %s1605_s24, %s2512_s25  ;;  %p2517_p9 = scmp.lt.s32.totalorder %s1605_s24, %s1605_s24 }
  0x32   :  { %3491 = vst [vmem:[#allocation35_spill] sm:$0xff] %v2718_v60  ;;  %3492 = vst [vmem:[#allocation36_spill] sm:$0xff] %v2720_v54  ;;  %v137_v16 = vand.u32 4294901760, %v42_v41  ;;  %v3495_v7 = vsub.s32 1, %v2575_v3  ;;  %v3496_v60 = vsub.s32 0, %v2575_v3  ;;  %2347 = vmatpush3.bf16.msra.mxu0 %v2716_v22  ;;  %v2741_v52 = vpack.c.bf16 %v185_v5, %v182_v15  ;;  %p2518_p10 = scmp.lt.s32.totalorder %s2516_s26, %s2512_s25 }
  0x33   :  { %3493 = vst [vmem:[#allocation37_spill] sm:$0xff] %v2727_v56  ;;  %3494 = vst [vmem:[#allocation38_spill] sm:$0xff] %v2729_v13  ;;  %v2743_v18 = vsub.f32 %v58_v2, %v185_v5  ;;  %v2745_v0 = vpack.c.bf16 %v999_v43, %v996_v21  ;;  %v2747_v38 = vsub.f32 %v73_v8, %v996_v21  ;;  %2348 = vmatprep.subr.bf16.mxu0 %v3485_v58 }
  0x34   :  { %v83_v54 = vrot.slane %v26_v39, %v3495_v7  ;;  %v79_v1 = vrot.slane %v26_v39, %v3496_v60  ;;  %3497 = vst [vmem:[#allocation39_spill] sm:$0xff] %v2741_v52  ;;  %2162 = vmatpush3.bf16.msra.mxu1 %v2727_v56  ;;  %v2751_v45 = vsub.f32 %v74_v31, %v999_v43  ;;  %v3377_v8 = vand.u32 4294901760, %v2582_v23  ;;  %p2519_p11 = por %p2518_p10, %p2517_p9 }
  0x35   :  { %3498 = vst [vmem:[#allocation40_spill] sm:$0xff] %v2745_v0  ;;  %3499 = vst [vmem:[#allocation41_spill] sm:$0xff] %v2747_v38  ;;  %v2753_v7 = vpack.c.bf16 %v137_v16, %v134_v37  ;;  %v2755_v20 = vsub.f32 %v41_v29, %v134_v37  ;;  %2164 = vmatprep.subr.bf16.mxu1 %v2741_v52  ;;  %v2760_v2 = vsub.f32 %v42_v41, %v137_v16 }
  0x36   :  { %3500 = vst [vmem:[#allocation42_spill] sm:$0xff] %v2751_v45  ;;  %v2757_v60 = vand.u32 4294901760, %v83_v54  ;;  %v2762_v15 = vand.u32 4294901760, %v79_v1  ;;  %v3378_v5 = vand.u32 4294901760, %v2584_v24  ;;  %v3505_v31 = vsub.s32 2, %v2575_v3  ;;  %2350 = vmatpush3.bf16.msra.mxu0 %v2745_v0  ;;  %p2520_p12 = pnand %p2519_p11, %p2513_p8 }
  0x37   :  { %3501 = vst [vmem:[#allocation43_spill] sm:$0xff] %v2753_v7  ;;  %3503 = vst [vmem:[#allocation45_spill] sm:$0xff] %v2760_v2  ;;  %v3389_v29 = vand.u32 4294901760, %v2586_v25  ;;  %v3392_v37 = vand.u32 4294901760, %v2590_v30  ;;  %v319_v41 = vsub.f32 %v2582_v23, %v3377_v8  ;;  %2351 = vmatprep.subr.bf16.mxu0 %v3485_v58 }
  0x38   :  { %3502 = vst [vmem:[#allocation44_spill] sm:$0xff] %v2757_v60  ;;  %3504 = vst [vmem:[#allocation46_spill] sm:$0xff] %v2762_v15  ;;  %v2767_v21 = vsub.f32 %v83_v54, %v2757_v60  ;;  %v87_v43 = vrot.slane %v26_v39, %v3505_v31  ;;  %v2775_v16 = vsub.f32 %v79_v1, %v2762_v15  ;;  %2166 = vmatpush3.bf16.msra.mxu1 %v2753_v7 }
  0x39   :  { %v326_v54 = vsub.f32 %v2584_v24, %v3378_v5  ;;  %v1048_v1 = vsub.f32 %v2586_v25, %v3389_v29  ;;  %v1055_v8 = vsub.f32 %v2590_v30, %v3392_v37  ;;  %v320_v0 = vand.u32 4294901760, %v319_v41 }
  0x3a   :  { %3506 = vst [vmem:[#allocation47_spill] sm:$0xff] %v2775_v16  ;;  %v2787_v31 = vand.u32 4294901760, %v87_v43  ;;  %v3401_v5 = vand.u32 4294901760, %v2775_v16  ;;  %v3508_v7 = vand.u32 4294901760, %v2594_v32  ;;  %v3509_v52 = vand.u32 4294901760, %v2767_v21 }
  0x3b   :  { %v327_v3 = vand.u32 4294901760, %v326_v54  ;;  %v1049_v29 = vand.u32 4294901760, %v1048_v1  ;;  %v1056_v15 = vand.u32 4294901760, %v1055_v8  ;;  %v3406_v54 = vand.u32 4294901760, %v2597_v34 }
  0x3c   :  { %3507 = vst [vmem:[#allocation48_spill] sm:$0xff] %v2787_v31  ;;  %v207_v39 = vsub.f32 %v2594_v32, %v3508_v7  ;;  %v190_v56 = vsub.f32 %v2767_v21, %v3509_v52  ;;  %v2803_v22 = vsub.f32 %v87_v43, %v2787_v31  ;;  %v196_v37 = vsub.f32 %v2775_v16, %v3401_v5 }
  0x3d   :  { %v2167_v30 = vpack.c.bf16 %v327_v3, %v320_v0  ;;  %v2352_v32 = vpack.c.bf16 %v1056_v15, %v1049_v29  ;;  %v3404_v24 = vand.u32 4294901760, %v2604_v46  ;;  %v214_v8 = vsub.f32 %v2597_v34, %v3406_v54 }
  0x3e   :  { %3510 = vst [vmem:[#allocation49_spill] sm:$0xff] %v2803_v22  ;;  %v208_v41 = vand.u32 4294901760, %v207_v39  ;;  %v191_v25 = vand.u32 4294901760, %v190_v56  ;;  %v3402_v7 = vand.u32 4294901760, %v2803_v22  ;;  %v197_v52 = vand.u32 4294901760, %v196_v37 }
  0x3f   :  { %2168 = vmatprep.subr.bf16.mxu1 %v2167_v30  ;;  %v3403_v43 = vand.u32 4294901760, %v2606_v47  ;;  %v3405_v1 = vand.u32 4294901760, %v2608_v48  ;;  %v333_v0 = vsub.f32 %v2604_v46, %v3404_v24  ;;  %v3407_v15 = vand.u32 4294901760, %v2612_v53 }
  0x40   :  { %192 = vmatprep.mubr.f32.mxu1 %v191_v25  ;;  %v1037_v56 = vsub.f32 %v2803_v22, %v3402_v7  ;;  %v3410_v30 = vand.u32 4294901760, %v2616_v55  ;;  %v215_v29 = vand.u32 4294901760, %v214_v8  ;;  %v3432_v3 = vand.u32 4294901760, %v2619_v57 }
  0x41   :  { %198 = vmatmul.mubr.f32.vlgmr.msra.gmra.mrb[0].mxu1 %v197_v52  ;;  %v340_v37 = vsub.f32 %v2606_v47, %v3403_v43  ;;  %v1062_v25 = vsub.f32 %v2608_v48, %v3405_v1  ;;  %v334_v5 = vand.u32 4294901760, %v333_v0  ;;  %v1069_v7 = vsub.f32 %v2612_v53, %v3407_v15 }
  0x42   :  { %v1038_v39 = vand.u32 4294901760, %v1037_v56  ;;  %v221_v52 = vsub.f32 %v2616_v55, %v3410_v30  ;;  %428 = vmatprep.mubr.f32.mxu1 %v2757_v60  ;;  %v2169_v8 = vpack.c.bf16 %v215_v29, %v208_v41  ;;  %v228_v1 = vsub.f32 %v2619_v57, %v3432_v3 }
  0x43   :  { %v341_v43 = vand.u32 4294901760, %v340_v37  ;;  %v1063_v24 = vand.u32 4294901760, %v1062_v25  ;;  %v1070_v56 = vand.u32 4294901760, %v1069_v7  ;;  %v3424_v54 = vand.u32 4294901760, %v2621_v59 }
  0x44   :  { %1958 = vmatmul.mubr.f32.vlgmr.msra.gmra.mrb[0].mxu0 %v1038_v39  ;;  %v222_v0 = vand.u32 4294901760, %v221_v52  ;;  %v3422_v15 = vand.u32 4294901760, %v2628_v10  ;;  %2170 = vmatpush3.bf16.msra.mxu1 %v2169_v8  ;;  %v229_v30 = vand.u32 4294901760, %v228_v1  ;;  %v3415_v60 = vand.u32 4294901760, %v2630_v11 }
  0x45   :  { %2353 = vmatpush3.bf16.msra.mxu0 %v2352_v32  ;;  %v2171_v16 = vpack.c.bf16 %v341_v43, %v334_v5  ;;  %v3413_v41 = vand.u32 4294901760, %v2634_v17  ;;  %v2355_v29 = vpack.c.bf16 %v1070_v56, %v1063_v24  ;;  %v347_v7 = vsub.f32 %v2621_v59, %v3424_v54 }
  0x46   :  { %2354 = vmatprep.subr.bf16.mxu0 %v3485_v58  ;;  %v354_v37 = vsub.f32 %v2628_v10, %v3422_v15  ;;  %v3414_v32 = vand.u32 4294901760, %v2638_v19  ;;  %v3511_v25 = vmov 0.0   ;;  %v2173_v5 = vpack.c.bf16 %v229_v30, %v222_v0 }
  0x47   :  { %1992 = vmatprep.mubr.msk.f32.mxu0 %vm2542_vm0, %v3511_v25  ;;  %2172 = vmatprep.subr.bf16.mxu1 %v2171_v16  ;;  %v1076_v43 = vsub.f32 %v2630_v11, %v3415_v60  ;;  %v1083_v24 = vsub.f32 %v2634_v17, %v3413_v41  ;;  %v3416_v1 = vand.u32 4294901760, %v2641_v27  ;;  %v348_v39 = vand.u32 4294901760, %v347_v7 }
  0x48   :  { %v355_v52 = vand.u32 4294901760, %v354_v37  ;;  %v235_v8 = vsub.f32 %v2638_v19, %v3414_v32  ;;  %v3417_v56 = vand.u32 4294901760, %v2645_v33  ;;  %2174 = vmatpush3.bf16.msra.mxu1 %v2173_v5  ;;  %v3420_v41 = vand.u32 4294901760, %v2647_v35 }
  0x49   :  { %2356 = vmatpush3.bf16.msra.mxu0 %v2355_v29  ;;  %v1077_v16 = vand.u32 4294901760, %v1076_v43  ;;  %v1084_v30 = vand.u32 4294901760, %v1083_v24  ;;  %v242_v0 = vsub.f32 %v2641_v27, %v3416_v1  ;;  %v3418_v60 = vand.u32 4294901760, %v2655_v50 }
  0x4a   :  { %2357 = vmatprep.subr.bf16.mxu0 %v3485_v58  ;;  %v2175_v7 = vpack.c.bf16 %v355_v52, %v348_v39  ;;  %v236_v37 = vand.u32 4294901760, %v235_v8  ;;  %v361_v32 = vsub.f32 %v2645_v33, %v3417_v56  ;;  %v368_v43 = vsub.f32 %v2647_v35, %v3420_v41 }
  0x4b   :  { %v2358_v29 = vpack.c.bf16 %v1084_v30, %v1077_v16  ;;  %v243_v5 = vand.u32 4294901760, %v242_v0  ;;  %v3419_v24 = vand.u32 4294901760, %v2657_v51  ;;  %v1090_v39 = vsub.f32 %v2655_v50, %v3418_v60 }
  0x4c   :  { %2176 = vmatprep.subr.bf16.mxu1 %v2175_v7  ;;  %v362_v1 = vand.u32 4294901760, %v361_v32  ;;  %v3421_v52 = vand.u32 4294901760, %v2661_v62  ;;  %v3423_v8 = vand.u32 4294901760, %v2663_v63  ;;  %v369_v16 = vand.u32 4294901760, %v368_v43 }
  0x4d   :  { %2359 = vmatpush3.bf16.msra.mxu0 %v2358_v29  ;;  %v2177_v56 = vpack.c.bf16 %v243_v5, %v236_v37  ;;  %v1097_v30 = vsub.f32 %v2657_v51, %v3419_v24  ;;  %v3430_v0 = vand.u32 4294901760, %v2667_v12  ;;  %v1091_v32 = vand.u32 4294901760, %v1090_v39 }
  0x4e   :  { %2360 = vmatprep.subr.bf16.mxu0 %v3485_v58  ;;  %v249_v7 = vsub.f32 %v2661_v62, %v3421_v52  ;;  %v256_v60 = vsub.f32 %v2663_v63, %v3423_v8  ;;  %v3425_v37 = vand.u32 4294901760, %v2671_v4  ;;  %v2179_v29 = vpack.c.bf16 %v369_v16, %v362_v1 }
  0x4f   :  { %2178 = vmatpush3.bf16.msra.mxu1 %v2177_v56  ;;  %v1098_v5 = vand.u32 4294901760, %v1097_v30  ;;  %v375_v43 = vsub.f32 %v2667_v12, %v3430_v0  ;;  %v3429_v24 = vand.u32 4294901760, %v2675_v36  ;;  %v3427_v15 = vand.u32 4294901760, %v2679_v14 }
  0x50   :  { %v250_v39 = vand.u32 4294901760, %v249_v7  ;;  %v257_v41 = vand.u32 4294901760, %v256_v60  ;;  %v382_v52 = vsub.f32 %v2671_v4, %v3425_v37  ;;  %2180 = vmatprep.subr.bf16.mxu1 %v2179_v29  ;;  %v3426_v56 = vand.u32 4294901760, %v2681_v40 }
  0x51   :  { %v2361_v8 = vpack.c.bf16 %v1098_v5, %v1091_v32  ;;  %v376_v54 = vand.u32 4294901760, %v375_v43  ;;  %v1104_v1 = vsub.f32 %v2675_v36, %v3429_v24  ;;  %v1111_v60 = vsub.f32 %v2679_v14, %v3427_v15 }
  0x52   :  { %v2181_v16 = vpack.c.bf16 %v257_v41, %v250_v39  ;;  %v383_v30 = vand.u32 4294901760, %v382_v52  ;;  %v3428_v7 = vand.u32 4294901760, %v2685_v28  ;;  %v263_v32 = vsub.f32 %v2681_v40, %v3426_v56 }
  0x53   :  { %2362 = vmatpush3.bf16.msra.mxu0 %v2361_v8  ;;  %v1105_v37 = vand.u32 4294901760, %v1104_v1  ;;  %v3431_v29 = vand.u32 4294901760, %v2689_v26  ;;  %v3433_v5 = vand.u32 4294901760, %v2692_v44  ;;  %v1112_v52 = vand.u32 4294901760, %v1111_v60 }
  0x54   :  { %2182 = vmatpush3.bf16.msra.mxu1 %v2181_v16  ;;  %2363 = vmatprep.subr.bf16.mxu0 %v3485_v58  ;;  %v2183_v41 = vpack.c.bf16 %v383_v30, %v376_v54  ;;  %v270_v43 = vsub.f32 %v2685_v28, %v3428_v7  ;;  %v3438_v8 = vand.u32 4294901760, %v2696_v6  ;;  %v264_v39 = vand.u32 4294901760, %v263_v32  ;;  %v3512_v16 = vld [vmem:[#allocation29_spill] sm:$0xff]  ;;  %v3513_v7 = vld [vmem:[#allocation30_spill] sm:$0xff] }
  0x55   :  { %v389_v1 = vsub.f32 %v2689_v26, %v3431_v29  ;;  %v396_v56 = vsub.f32 %v2692_v44, %v3433_v5  ;;  %v3436_v15 = vand.u32 4294901760, %v3512_v16  ;;  %v2364_v54 = vpack.c.bf16 %v1112_v52, %v1105_v37 }
  0x56   :  { %2184 = vmatprep.subr.bf16.mxu1 %v2183_v41  ;;  %v271_v30 = vand.u32 4294901760, %v270_v43  ;;  %v1118_v60 = vsub.f32 %v2696_v6, %v3438_v8  ;;  %v3437_v24 = vand.u32 4294901760, %v3513_v7  ;;  %v3440_v3 = vand.u32 4294901760, %v2707_v9 }
  0x57   :  { %v390_v32 = vand.u32 4294901760, %v389_v1  ;;  %v397_v0 = vand.u32 4294901760, %v396_v56  ;;  %v1125_v29 = vsub.f32 %v3512_v16, %v3436_v15  ;;  %2365 = vmatpush3.bf16.msra.mxu0 %v2364_v54  ;;  %v3441_v41 = vand.u32 4294901760, %v2711_v42  ;;  %v3514_v1 = vld [vmem:[#allocation33_spill] sm:$0xff] }
  0x58   :  { %v2185_v5 = vpack.c.bf16 %v271_v30, %v264_v39  ;;  %v1119_v22 = vand.u32 4294901760, %v1118_v60  ;;  %v277_v37 = vsub.f32 %v3513_v7, %v3437_v24  ;;  %2366 = vmatprep.subr.bf16.mxu0 %v3485_v58  ;;  %v284_v56 = vsub.f32 %v2707_v9, %v3440_v3  ;;  %v3515_v30 = vld [vmem:[#allocation35_spill] sm:$0xff]  ;;  %v3516_v24 = vld [vmem:[#allocation36_spill] sm:$0xff] }
  0x59   :  { %v2187_v52 = vpack.c.bf16 %v397_v0, %v390_v32  ;;  %v1126_v43 = vand.u32 4294901760, %v1125_v29  ;;  %v3442_v15 = vand.u32 4294901760, %v3514_v1  ;;  %v403_v39 = vsub.f32 %v2711_v42, %v3441_v41 }
  0x5a   :  { %2186 = vmatpush3.bf16.msra.mxu1 %v2185_v5  ;;  %v278_v54 = vand.u32 4294901760, %v277_v37  ;;  %v3443_v60 = vand.u32 4294901760, %v3515_v30  ;;  %v3444_v8 = vand.u32 4294901760, %v3516_v24  ;;  %v285_v0 = vand.u32 4294901760, %v284_v56 }
  0x5b   :  { %2188 = vmatprep.subr.bf16.mxu1 %v2187_v52  ;;  %v2367_v7 = vpack.c.bf16 %v1126_v43, %v1119_v22  ;;  %v410_v29 = vsub.f32 %v3514_v1, %v3442_v15  ;;  %v3445_v32 = vand.u32 4294901760, %v2729_v13  ;;  %v404_v3 = vand.u32 4294901760, %v403_v39 }
  0x5c   :  { %v1132_v5 = vsub.f32 %v3515_v30, %v3443_v60  ;;  %v1139_v37 = vsub.f32 %v3516_v24, %v3444_v8  ;;  %v3448_v41 = vand.u32 4294901760, %v2731_v49  ;;  %v2189_v22 = vpack.c.bf16 %v285_v0, %v278_v54 }
  0x5d   :  { %2368 = vmatpush3.bf16.msra.mxu0 %v2367_v7  ;;  %v411_v52 = vand.u32 4294901760, %v410_v29  ;;  %v291_v43 = vsub.f32 %v2729_v13, %v3445_v32  ;;  %v3452_v56 = vand.u32 4294901760, %v2734_v61  ;;  %v3451_v8 = vand.u32 4294901760, %v2743_v18 }
  0x5e   :  { %2369 = vmatprep.subr.bf16.mxu0 %v3485_v58  ;;  %v1133_v39 = vand.u32 4294901760, %v1132_v5  ;;  %v1140_v15 = vand.u32 4294901760, %v1139_v37  ;;  %v298_v60 = vsub.f32 %v2731_v49, %v3448_v41  ;;  %2190 = vmatpush3.bf16.msra.mxu1 %v2189_v22  ;;  %v3449_v29 = vand.u32 4294901760, %v2747_v38 }
  0x5f   :  { %v2191_v7 = vpack.c.bf16 %v411_v52, %v404_v3  ;;  %v292_v54 = vand.u32 4294901760, %v291_v43  ;;  %v417_v0 = vsub.f32 %v2734_v61, %v3452_v56  ;;  %v424_v5 = vsub.f32 %v2743_v18, %v3451_v8 }
  0x60   :  { %v2370_v32 = vpack.c.bf16 %v1140_v15, %v1133_v39  ;;  %v299_v13 = vand.u32 4294901760, %v298_v60  ;;  %v3450_v37 = vand.u32 4294901760, %v2751_v45  ;;  %v1146_v3 = vsub.f32 %v2747_v38, %v3449_v29 }
  0x61   :  { %2192 = vmatprep.subr.bf16.mxu1 %v2191_v7  ;;  %v418_v41 = vand.u32 4294901760, %v417_v0  ;;  %v3457_v22 = vand.u32 4294901760, %v2755_v20  ;;  %v3458_v52 = vand.u32 4294901760, %v2760_v2  ;;  %v425_v15 = vand.u32 4294901760, %v424_v5 }
  0x62   :  { %2371 = vmatpush3.bf16.msra.mxu0 %v2370_v32  ;;  %v2193_v43 = vpack.c.bf16 %v299_v13, %v292_v54  ;;  %v1153_v60 = vsub.f32 %v2751_v45, %v3450_v37  ;;  %v1147_v39 = vand.u32 4294901760, %v1146_v3  ;;  %v3517_v37 = vld [vmem:[#allocation9_spill] sm:$0xff]  ;;  %v3518_v3 = vld [vmem:[#allocation10_spill] sm:$0xff]  ;;  %v3519_v45 = vld [vmem:[#allocation12_spill] sm:$0xff] }
  0x63   :  { %2372 = vmatprep.subr.bf16.mxu0 %v3485_v58  ;;  %v305_v7 = vsub.f32 %v2755_v20, %v3457_v22  ;;  %v312_v0 = vsub.f32 %v2760_v2, %v3458_v52  ;;  %v2195_v29 = vpack.c.bf16 %v425_v15, %v418_v41  ;;  %v2199_v8 = vpack.c.bf16 %v3517_v37, %v2582_v23  ;;  %v3520_v22 = vld [vmem:[#allocation14_spill] sm:$0xff] }
  0x64   :  { %2194 = vmatpush3.bf16.msra.mxu1 %v2193_v43  ;;  %v1154_v32 = vand.u32 4294901760, %v1153_v60  ;;  %v2376_v38 = vpack.c.bf16 %v3519_v45, %v3518_v3  ;;  %v2201_v43 = vpack.c.bf16 %v2597_v34, %v3520_v22  ;;  %v2203_v41 = vpack.c.bf16 %v2606_v47, %v2604_v46  ;;  %v3527_v2 = vld [vmem:[#allocation46_spill] sm:$0xff] }
  0x65   :  { %v306_v13 = vand.u32 4294901760, %v305_v7  ;;  %v313_v54 = vand.u32 4294901760, %v312_v0  ;;  %2196 = vmatprep.subr.bf16.mxu1 %v2195_v29  ;;  %v2379_v29 = vpack.c.bf16 %v2612_v53, %v2608_v48  ;;  %v2205_v15 = vpack.c.bf16 %v2619_v57, %v2616_v55 }
  0x66   :  { %v2373_v5 = vpack.c.bf16 %v1154_v32, %v1147_v39  ;;  %v2207_v60 = vpack.c.bf16 %v2628_v10, %v2621_v59  ;;  %v2209_v39 = vpack.c.bf16 %v2641_v27, %v2638_v19  ;;  %v3521_v7 = vand.u32 4294901760, %v2582_v23 }
  0x67   :  { %v2197_v56 = vpack.c.bf16 %v313_v54, %v306_v13  ;;  %v3523_v32 = vand.u32 4294901760, %v3518_v3  ;;  %v3524_v13 = vand.u32 4294901760, %v3519_v45  ;;  %v3526_v52 = vand.u32 4294901760, %v2597_v34 }
  0x68   :  { %2374 = vmatpush3.bf16.msra.mxu0 %v2373_v5  ;;  %v3525_v5 = vand.u32 4294901760, %v3520_v22  ;;  %v3528_v23 = vand.u32 4294901760, %v2604_v46  ;;  %v3530_v3 = vand.u32 4294901760, %v2608_v48  ;;  %v3531_v45 = vand.u32 4294901760, %v2612_v53 }
  0x69   :  { %2198 = vmatpush3.bf16.msra.mxu1 %v2197_v56  ;;  %2375 = vmatprep.subr.bf16.mxu0 %v3485_v58  ;;  %v2382_v56 = vpack.c.bf16 %v2634_v17, %v2630_v11  ;;  %v3024_v54 = vpack.c.bf16 %v3524_v13, %v3523_v32  ;;  %v3532_v22 = vand.u32 4294901760, %v2616_v55  ;;  %v3533_v34 = vand.u32 4294901760, %v2619_v57 }
  0x6a   :  { %2200 = vmatprep.subr.bf16.mxu1 %v2199_v8  ;;  %v3522_v8 = vand.u32 4294901760, %v3517_v37  ;;  %v3529_v37 = vand.u32 4294901760, %v2606_v47  ;;  %v3534_v46 = vand.u32 4294901760, %v2621_v59  ;;  %v3535_v47 = vand.u32 4294901760, %v2628_v10 }
  0x6b   :  { %1993 = vmatmul.mubr.f32.vlgmr.msra.gmra.mrb[0].mxu0 %v2787_v31  ;;  %v3030_v31 = vpack.c.bf16 %v3526_v52, %v3525_v5  ;;  %v3049_v52 = vpack.c.bf16 %v3533_v34, %v3532_v22  ;;  %v3536_v48 = vand.u32 4294901760, %v2630_v11  ;;  %v3537_v53 = vand.u32 4294901760, %v2634_v17 }
  0x6c   :  { %v3018_v0 = vpack.c.bf16 %v3522_v8, %v3521_v7  ;;  %430 = vmatmul.mubr.f32.vlgmr.msra.gmra.mrb[2].mxu1 %v3527_v2  ;;  %2377 = vmatpush3.bf16.msra.mxu0 %v2376_v38  ;;  %v3037_v7 = vpack.c.bf16 %v3529_v37, %v3528_v23  ;;  %v3043_v8 = vpack.c.bf16 %v3531_v45, %v3530_v3  ;;  %v3538_v55 = vand.u32 4294901760, %v2638_v19 }
  0x6d   :  { %2202 = vmatpush3.bf16.msra.mxu1 %v2201_v43  ;;  %2378 = vmatprep.subr.bf16.mxu0 %v3485_v58  ;;  %v3056_v38 = vpack.c.bf16 %v3535_v47, %v3534_v46  ;;  %v3062_v32 = vpack.c.bf16 %v3537_v53, %v3536_v48  ;;  %v3539_v57 = vand.u32 4294901760, %v2641_v27  ;;  %v3540_v59 = vand.u32 4294901760, %v2645_v33 }
  0x6e   :  { %2204 = vmatprep.subr.bf16.mxu1 %v2203_v41  ;;  %565 = vmatprep.mubr.f32.mxu1 %v2767_v21  ;;  %v3541_v10 = vand.u32 4294901760, %v2647_v35  ;;  %v3542_v11 = vand.u32 4294901760, %v2655_v50  ;;  %v3543_v17 = vand.u32 4294901760, %v2657_v51  ;;  %v3544_v19 = vand.u32 4294901760, %v2661_v62 }
  0x6f   :  { %v3068_v13 = vpack.c.bf16 %v3539_v57, %v3538_v55  ;;  %v3545_v27 = vand.u32 4294901760, %v2663_v63  ;;  %2027 = vmatprep.mubr.msk.f32.mxu0 %vm2542_vm0, %v3511_v25  ;;  %v3546_v41 = vand.u32 4294901760, %v2667_v12  ;;  %v3547_v37 = vand.u32 4294901760, %v2671_v4 }
  0x70   :  { %v3075_v43 = vpack.c.bf16 %v3541_v10, %v3540_v59  ;;  %v3081_v5 = vpack.c.bf16 %v3543_v17, %v3542_v11  ;;  %v3548_v45 = vand.u32 4294901760, %v2675_v36  ;;  %v3549_v22 = vand.u32 4294901760, %v2679_v14  ;;  %2380 = vmatpush3.bf16.msra.mxu0 %v2379_v29  ;;  %v3556_v17 = vld [vmem:[#allocation30_spill] sm:$0xff] }
  0x71   :  { %v3087_v23 = vpack.c.bf16 %v3545_v27, %v3544_v19  ;;  %v3095_v3 = vpack.c.bf16 %v3547_v37, %v3546_v41  ;;  %v3550_v46 = vand.u32 4294901760, %v2681_v40  ;;  %v3551_v47 = vand.u32 4294901760, %v2685_v28  ;;  %2206 = vmatpush3.bf16.msra.mxu1 %v2205_v15  ;;  %2381 = vmatprep.subr.bf16.mxu0 %v3485_v58 }
  0x72   :  { %v3101_v34 = vpack.c.bf16 %v3549_v22, %v3548_v45  ;;  %v3552_v53 = vand.u32 4294901760, %v2689_v26  ;;  %v3553_v55 = vand.u32 4294901760, %v2692_v44  ;;  %v3554_v59 = vand.u32 4294901760, %v2696_v6  ;;  %2208 = vmatprep.subr.bf16.mxu1 %v2207_v60  ;;  %v3592_v60 = vld [vmem:[#allocation23_spill] sm:$0xff] }
  0x73   :  { %v3107_v48 = vpack.c.bf16 %v3551_v47, %v3550_v46  ;;  %v3555_v10 = vand.u32 4294901760, %v3512_v16  ;;  %v3557_v19 = vand.u32 4294901760, %v3556_v17  ;;  %v3558_v27 = vand.u32 4294901760, %v2707_v9 }
  0x74   :  { %v3113_v57 = vpack.c.bf16 %v3553_v55, %v3552_v53  ;;  %v3559_v37 = vand.u32 4294901760, %v2711_v42  ;;  %v3560_v45 = vand.u32 4294901760, %v3514_v1  ;;  %v3562_v29 = vand.u32 4294901760, %v3515_v30  ;;  %v3565_v53 = vld [vmem:[#allocation38_spill] sm:$0xff]  ;;  %2383 = vmatpush3.bf16.msra.mxu0 %v2382_v56  ;;  %v3593_v56 = vld [vmem:[#allocation24_spill] sm:$0xff] }
  0x75   :  { %v3119_v11 = vpack.c.bf16 %v3555_v10, %v3554_v59  ;;  %v3125_v41 = vpack.c.bf16 %v3558_v27, %v3557_v19  ;;  %v3563_v46 = vand.u32 4294901760, %v3516_v24  ;;  %v3566_v55 = vand.u32 4294901760, %v3565_v53  ;;  %2210 = vmatpush3.bf16.msra.mxu1 %v2209_v39  ;;  %2384 = vmatprep.subr.bf16.mxu0 %v3485_v58  ;;  %v3594_v39 = vld [vmem:[#allocation25_spill] sm:$0xff] }
  0x76   :  { %v3131_v22 = vpack.c.bf16 %v3560_v45, %v3559_v37  ;;  %v3567_v59 = vand.u32 4294901760, %v2731_v49  ;;  %v3569_v19 = vand.u32 4294901760, %v2734_v61  ;;  %v3570_v27 = vand.u32 4294901760, %v2743_v18  ;;  %v3571_v45 = vld [vmem:[#allocation41_spill] sm:$0xff] }
  0x77   :  { %v3137_v47 = vpack.c.bf16 %v3563_v46, %v3562_v29  ;;  %v3572_v2 = vand.u32 4294901760, %v3571_v45  ;;  %v2211_v15 = vpack.c.bf16 %v2647_v35, %v2645_v33  ;;  %v2215_v33 = vpack.c.bf16 %v2671_v4, %v2667_v12 }
  0x78   :  { %3561 = vst [vmem:[#allocation29_spill] sm:$0xff] %v3131_v22  ;;  %v3144_v10 = vpack.c.bf16 %v3567_v59, %v3566_v55  ;;  %v3150_v37 = vpack.c.bf16 %v3570_v27, %v3569_v19  ;;  %v3573_v22 = vld [vmem:[#allocation42_spill] sm:$0xff]  ;;  %v3576_v55 = vld [vmem:[#allocation45_spill] sm:$0xff]  ;;  %v2385_v19 = vpack.c.bf16 %v2657_v51, %v2655_v50  ;;  %v2388_v35 = vpack.c.bf16 %v2679_v14, %v2675_v36  ;;  %v3599_v27 = vld [vmem:[#allocation32_spill] sm:$0xff] }
  0x79   :  { %3564 = vst [vmem:[#allocation33_spill] sm:$0xff] %v3137_v47  ;;  %v3574_v29 = vand.u32 4294901760, %v3573_v22  ;;  %v3575_v47 = vand.u32 4294901760, %v2755_v20  ;;  %v3577_v59 = vand.u32 4294901760, %v3576_v55  ;;  %2212 = vmatprep.subr.bf16.mxu1 %v2211_v15  ;;  %v2217_v50 = vpack.c.bf16 %v2685_v28, %v2681_v40  ;;  %v3578_v40 = vld [vmem:[#allocation8_spill] sm:$0xff]  ;;  %v3602_v15 = vld [vmem:[#allocation39_spill] sm:$0xff] }
  0x7a   :  { %3568 = vst [vmem:[#allocation35_spill] sm:$0xff] %v3144_v10  ;;  %2386 = vmatpush3.bf16.msra.mxu0 %v2385_v19  ;;  %v2219_v51 = vpack.c.bf16 %v2692_v44, %v2689_v26  ;;  %v2223_v12 = vpack.c.bf16 %v3514_v1, %v2711_v42  ;;  %v2394_v28 = vpack.c.bf16 %v3516_v24, %v3515_v30  ;;  %v3579_v42 = vld [vmem:[#allocation49_spill] sm:$0xff]  ;;  %v3580_v26 = vld [vmem:[#allocation47_spill] sm:$0xff]  ;;  %v3587_v24 = vld [vmem:[#allocation18_spill] sm:$0xff] }
  0x7b   :  { %v3156_v46 = vpack.c.bf16 %v3574_v29, %v3572_v2  ;;  %v3164_v10 = vpack.c.bf16 %v3577_v59, %v3575_v47  ;;  %v2213_v2 = vpack.c.bf16 %v2663_v63, %v2661_v62  ;;  %2387 = vmatprep.subr.bf16.mxu0 %v3485_v58  ;;  %v2391_v62 = vpack.c.bf16 %v3512_v16, %v2696_v6  ;;  %v3581_v44 = vld [vmem:[#allocation11_spill] sm:$0xff]  ;;  %v3589_v1 = vld [vmem:[#allocation20_spill] sm:$0xff]  ;;  %v3590_v30 = vld [vmem:[#allocation21_spill] sm:$0xff] }
  0x7c   :  { %v2221_v63 = vpack.c.bf16 %v2707_v9, %v3556_v17  ;;  %v2225_v6 = vpack.c.bf16 %v2731_v49, %v3565_v53  ;;  %v2227_v4 = vpack.c.bf16 %v2743_v18, %v2734_v61  ;;  %v2397_v36 = vpack.c.bf16 %v3573_v22, %v3571_v45  ;;  %v3582_v9 = vld [vmem:[#allocation13_spill] sm:$0xff]  ;;  %v3583_v49 = vld [vmem:[#allocation15_spill] sm:$0xff]  ;;  %v3585_v61 = vld [vmem:[#allocation16_spill] sm:$0xff] }
  0x7d   :  { %2214 = vmatpush3.bf16.msra.mxu1 %v2213_v2  ;;  %v2229_v14 = vpack.c.bf16 %v3576_v55, %v2755_v20  ;;  %v3584_v20 = vand.u32 4294901760, %v2767_v21  ;;  %v3586_v18 = vld [vmem:[#allocation17_spill] sm:$0xff]  ;;  %v3588_v16 = vld [vmem:[#allocation19_spill] sm:$0xff]  ;;  %v3591_v21 = vld [vmem:[#allocation22_spill] sm:$0xff]  ;;  %v3605_v19 = vand.u32 4294901760, %v3579_v42  ;;  %v3606_v2 = vand.u32 4294901760, %v3580_v26 }
  0x7e   :  { %2216 = vmatprep.subr.bf16.mxu1 %v2215_v33  ;;  %2389 = vmatpush3.bf16.msra.mxu0 %v2388_v35  ;;  %v3595_v17 = vld [vmem:[#allocation26_spill] sm:$0xff]  ;;  %v3596_v22 = vld [vmem:[#allocation27_spill] sm:$0xff]  ;;  %v3597_v47 = vld [vmem:[#allocation28_spill] sm:$0xff] }
  0x7f   :  { %2390 = vmatprep.subr.bf16.mxu0 %v3485_v58  ;;  %v3598_v53 = vld [vmem:[#allocation31_spill] sm:$0xff]  ;;  %v3600_v45 = vld [vmem:[#allocation34_spill] sm:$0xff]  ;;  %v3601_v29 = vld [vmem:[#allocation37_spill] sm:$0xff] }
  0x80   :  { %v3603_v55 = vld [vmem:[#allocation40_spill] sm:$0xff]  ;;  %v3604_v59 = vld [vmem:[#allocation43_spill] sm:$0xff] }
  0x81   :  { %2218 = vmatpush3.bf16.msra.mxu1 %v2217_v50  ;;  %v3607_v33 = vld [vmem:[#allocation44_spill] sm:$0xff] }
  0x82   :  { %2220 = vmatprep.subr.bf16.mxu1 %v2219_v51  ;;  %2392 = vmatpush3.bf16.msra.mxu0 %v2391_v62 }
  0x83   :  { %2393 = vmatprep.subr.bf16.mxu0 %v3485_v58 }
  0x85   :  { %2222 = vmatpush3.bf16.msra.mxu1 %v2221_v63 }
  0x86   :  { %2224 = vmatprep.subr.bf16.mxu1 %v2223_v12  ;;  %2395 = vmatpush3.bf16.msra.mxu0 %v2394_v28 }
  0x87   :  { %2396 = vmatprep.subr.bf16.mxu0 %v3485_v58 }
  0x89   :  { %2226 = vmatpush3.bf16.msra.mxu1 %v2225_v6 }
  0x8a   :  { %2228 = vmatprep.subr.bf16.mxu1 %v2227_v4  ;;  %2398 = vmatpush3.bf16.msra.mxu0 %v2397_v36 }
  0x8b   :  { %2399 = vmatprep.subr.bf16.mxu0 %v3485_v58 }
  0x8d   :  { %2230 = vmatpush3.bf16.msra.mxu1 %v2229_v14  ;;  %2028 = vmatmul.mubr.f32.vlgmr.msra.gmra.mrb[0].mxu0 %v3579_v42 }
  0x8e   :  { %2232 = vmatprep.subr.bf16.mxu1 %v3578_v40  ;;  %2401 = vmatpush3.bf16.msra.mxu0 %v3581_v44 }
  0x8f   :  { %2402 = vmatprep.subr.bf16.mxu0 %v3485_v58  ;;  %2062 = vmatprep.mubr.msk.f32.mxu0 %vm2542_vm0, %v3511_v25 }
  0x90   :  { %568 = vmatmul.mubr.f32.vlgmr.msra.gmra.mrb[4].mxu1 %v3580_v26 }
  0x91   :  { %2234 = vmatpush3.bf16.msra.mxu1 %v3582_v9  ;;  %672 = vmatprep.mubr.f32.mxu1 %v3584_v20 }
  0x92   :  { %2236 = vmatprep.subr.bf16.mxu1 %v3583_v49  ;;  %2404 = vmatpush3.bf16.msra.mxu0 %v3585_v61 }
  0x93   :  { %2405 = vmatprep.subr.bf16.mxu0 %v3485_v58 }
  0x95   :  { %2238 = vmatpush3.bf16.msra.mxu1 %v3586_v18 }
  0x96   :  { %2240 = vmatprep.subr.bf16.mxu1 %v3587_v24  ;;  %2407 = vmatpush3.bf16.msra.mxu0 %v3588_v16 }
  0x97   :  { %2408 = vmatprep.subr.bf16.mxu0 %v3485_v58 }
  0x99   :  { %2242 = vmatpush3.bf16.msra.mxu1 %v3589_v1 }
  0x9a   :  { %2244 = vmatprep.subr.bf16.mxu1 %v3590_v30  ;;  %2410 = vmatpush3.bf16.msra.mxu0 %v3591_v21 }
  0x9b   :  { %2411 = vmatprep.subr.bf16.mxu0 %v3485_v58 }
  0x9d   :  { %2246 = vmatpush3.bf16.msra.mxu1 %v3592_v60 }
  0x9e   :  { %2248 = vmatprep.subr.bf16.mxu1 %v3593_v56  ;;  %2413 = vmatpush3.bf16.msra.mxu0 %v3594_v39 }
  0x9f   :  { %2414 = vmatprep.subr.bf16.mxu0 %v3485_v58 }
  0xa1   :  { %2250 = vmatpush3.bf16.msra.mxu1 %v3595_v17 }
  0xa2   :  { %2252 = vmatprep.subr.bf16.mxu1 %v3596_v22  ;;  %2416 = vmatpush3.bf16.msra.mxu0 %v3597_v47 }
  0xa3   :  { %2417 = vmatprep.subr.bf16.mxu0 %v3485_v58 }
  0xa5   :  { %2254 = vmatpush3.bf16.msra.mxu1 %v3598_v53 }
  0xa6   :  { %2256 = vmatprep.subr.bf16.mxu1 %v3599_v27  ;;  %2419 = vmatpush3.bf16.msra.mxu0 %v3600_v45 }
  0xa7   :  { %2420 = vmatprep.subr.bf16.mxu0 %v3485_v58 }
  0xa9   :  { %2258 = vmatpush3.bf16.msra.mxu1 %v3601_v29 }
  0xaa   :  { %2260 = vmatprep.subr.bf16.mxu1 %v3602_v15  ;;  %2422 = vmatpush3.bf16.msra.mxu0 %v3603_v55 }
  0xab   :  { %2423 = vmatprep.subr.bf16.mxu0 %v3485_v58 }
  0xad   :  { %2262 = vmatpush3.bf16.msra.mxu1 %v3604_v59  ;;  %2063 = vmatmul.mubr.f32.vlgmr.msra.gmra.mrb[0].mxu0 %v3605_v19 }
  0xae   :  { %2264 = vmatprep.subr.bf16.mxu1 %v3018_v0  ;;  %2425 = vmatpush3.bf16.msra.mxu0 %v3024_v54  ;;  %v3609_v0 = vld [vmem:[#allocation33_spill] sm:$0xff]  ;;  %v3610_v54 = vld [vmem:[#allocation35_spill] sm:$0xff] }
  0xaf   :  { %2426 = vmatprep.subr.bf16.mxu0 %v3485_v58  ;;  %2097 = vmatprep.mubr.msk.f32.mxu0 %vm2542_vm0, %v3511_v25 }
  0xb0   :  { %676 = vmatmul.mubr.f32.vlgmr.msra.gmra.mrb[6].mxu1 %v3606_v2 }
  0xb1   :  { %2266 = vmatpush3.bf16.msra.mxu1 %v3030_v31  ;;  %842 = vmatprep.mubr.f32.mxu1 %v3607_v33  ;;  %v3608_v31 = vld [vmem:[#allocation29_spill] sm:$0xff] }
  0xb2   :  { %2268 = vmatprep.subr.bf16.mxu1 %v3037_v7  ;;  %2428 = vmatpush3.bf16.msra.mxu0 %v3043_v8  ;;  %v3611_v7 = vld [vmem:[#allocation48_spill] sm:$0xff]  ;;  %v3612_v8 = vld [vmem:[#allocation46_spill] sm:$0xff] }
  0xb3   :  { %2429 = vmatprep.subr.bf16.mxu0 %v3485_v58 }
  0xb5   :  { %2270 = vmatpush3.bf16.msra.mxu1 %v3049_v52 }
  0xb6   :  { %2272 = vmatprep.subr.bf16.mxu1 %v3056_v38  ;;  %2431 = vmatpush3.bf16.msra.mxu0 %v3062_v32 }
  0xb7   :  { %2432 = vmatprep.subr.bf16.mxu0 %v3485_v58 }
  0xb9   :  { %2274 = vmatpush3.bf16.msra.mxu1 %v3068_v13 }
  0xba   :  { %2276 = vmatprep.subr.bf16.mxu1 %v3075_v43  ;;  %2434 = vmatpush3.bf16.msra.mxu0 %v3081_v5 }
  0xbb   :  { %2435 = vmatprep.subr.bf16.mxu0 %v3485_v58 }
  0xbd   :  { %2278 = vmatpush3.bf16.msra.mxu1 %v3087_v23 }
  0xbe   :  { %2280 = vmatprep.subr.bf16.mxu1 %v3095_v3  ;;  %2437 = vmatpush3.bf16.msra.mxu0 %v3101_v34 }
  0xbf   :  { %2438 = vmatprep.subr.bf16.mxu0 %v3485_v58 }
  0xc1   :  { %2282 = vmatpush3.bf16.msra.mxu1 %v3107_v48 }
  0xc2   :  { %2284 = vmatprep.subr.bf16.mxu1 %v3113_v57  ;;  %2440 = vmatpush3.bf16.msra.mxu0 %v3119_v11 }
  0xc3   :  { %2441 = vmatprep.subr.bf16.mxu0 %v3485_v58 }
  0xc5   :  { %2286 = vmatpush3.bf16.msra.mxu1 %v3125_v41 }
  0xc6   :  { %2288 = vmatprep.subr.bf16.mxu1 %v3608_v31  ;;  %2443 = vmatpush3.bf16.msra.mxu0 %v3609_v0 }
  0xc7   :  { %2444 = vmatprep.subr.bf16.mxu0 %v3485_v58 }
  0xc9   :  { %2290 = vmatpush3.bf16.msra.mxu1 %v3610_v54 }
  0xca   :  { %2292 = vmatprep.subr.bf16.mxu1 %v3150_v37  ;;  %2446 = vmatpush3.bf16.msra.mxu0 %v3156_v46 }
  0xcb   :  { %2447 = vmatprep.subr.bf16.mxu0 %v3485_v58 }
  0xcd   :  { %2294 = vmatpush3.bf16.msra.mxu1 %v3164_v10  ;;  %2098 = vmatmul.mubr.f32.vlgmr.msra.gmra.mrb[0].mxu0 %v3611_v7 }
  0xce   :  { %2296 = vmatprep.subr.bf16.mxu1 %v3578_v40  ;;  %2449 = vmatpush3.bf16.msra.mxu0 %v3581_v44 }
  0xcf   :  { %2450 = vmatprep.subr.bf16.mxu0 %v3485_v58  ;;  %2132 = vmatprep.mubr.msk.f32.mxu0 %vm2542_vm0, %v3511_v25 }
  0xd0   :  { %844 = vmatmul.mubr.f32.vlgmr.msra.gmra.mrb[8].mxu1 %v3612_v8 }
  0xd1   :  { %2298 = vmatpush3.bf16.msra.mxu1 %v3582_v9  ;;  %946 = vmatprep.mubr.f32.mxu1 %v3607_v33 }
  0xd2   :  { %2300 = vmatprep.subr.bf16.mxu1 %v3583_v49  ;;  %2452 = vmatpush3.bf16.msra.mxu0 %v3585_v61 }
  0xd3   :  { %2453 = vmatprep.subr.bf16.mxu0 %v3485_v58 }
  0xd5   :  { %2302 = vmatpush3.bf16.msra.mxu1 %v3586_v18 }
  0xd6   :  { %2304 = vmatprep.subr.bf16.mxu1 %v3587_v24  ;;  %2455 = vmatpush3.bf16.msra.mxu0 %v3588_v16 }
  0xd7   :  { %2456 = vmatprep.subr.bf16.mxu0 %v3485_v58 }
  0xd9   :  { %2306 = vmatpush3.bf16.msra.mxu1 %v3589_v1 }
  0xda   :  { %2308 = vmatprep.subr.bf16.mxu1 %v3590_v30  ;;  %2458 = vmatpush3.bf16.msra.mxu0 %v3591_v21 }
  0xdb   :  { %2459 = vmatprep.subr.bf16.mxu0 %v3485_v58 }
  0xdd   :  { %2310 = vmatpush3.bf16.msra.mxu1 %v3592_v60 }
  0xde   :  { %2312 = vmatprep.subr.bf16.mxu1 %v3593_v56  ;;  %2461 = vmatpush3.bf16.msra.mxu0 %v3594_v39 }
  0xdf   :  { %2462 = vmatprep.subr.bf16.mxu0 %v3485_v58 }
  0xe1   :  { %2314 = vmatpush3.bf16.msra.mxu1 %v3595_v17 }
  0xe2   :  { %2316 = vmatprep.subr.bf16.mxu1 %v3596_v22  ;;  %2464 = vmatpush3.bf16.msra.mxu0 %v3597_v47 }
  0xe3   :  { %2465 = vmatprep.subr.bf16.mxu0 %v3485_v58 }
  0xe5   :  { %2318 = vmatpush3.bf16.msra.mxu1 %v3598_v53 }
  0xe6   :  { %2320 = vmatprep.subr.bf16.mxu1 %v3599_v27  ;;  %2467 = vmatpush3.bf16.msra.mxu0 %v3600_v45 }
  0xe7   :  { %2468 = vmatprep.subr.bf16.mxu0 %v3485_v58 }
  0xe9   :  { %2322 = vmatpush3.bf16.msra.mxu1 %v3601_v29 }
  0xea   :  { %2324 = vmatprep.subr.bf16.mxu1 %v3602_v15  ;;  %2470 = vmatpush3.bf16.msra.mxu0 %v3603_v55 }
  0xed   :  { %2326 = vmatpush3.bf16.msra.mxu1 %v3604_v59  ;;  %2133 = vmatmul.mubr.f32.vlgmr.msra.gmra.mrb[0].mxu0 %v3611_v7 }
  0xf0   :  { %948 = vmatmul.mubr.f32.vlgmr.msra.gmra.mrb[10].mxu1 %v3612_v8 }
 0x114   :  { %v1645_v25 = vpop.f32.mrb[0].mxu1 }
 0x115   :  { %v1646_v52 = vpop.f32.mrb[1].mxu1 }
 0x116   :  { %v1647_v38 = vadd.f32 %v1646_v52, %v1645_v25 }
 0x118   :  { %v200_v43 = vadd.f32 0.168, %v1647_v38 }
 0x13f   :  { %v1680_v32 = vpop.f32.mrb[2].mxu1 }
 0x140   :  { %v1681_v13 = vpop.f32.mrb[3].mxu1 }
 0x141   :  { %v1682_v5 = vadd.f32 %v1681_v13, %v1680_v32 }
 0x143   :  { %v432_v23 = vadd.f32 %v1682_v5, %v200_v43 }
 0x163   :  { %v1715_v3 = vpop.f32.mrb[4].mxu1 }
 0x164   :  { %v1716_v58 = vpop.f32.mrb[5].mxu1 }
 0x165   :  { %v1717_v34 = vadd.f32 %v1716_v58, %v1715_v3 }
 0x167   :  { %v570_v48 = vadd.f32 %v1717_v34, %v432_v23 }
 0x183   :  { %v1750_v57 = vpop.f32.mrb[6].mxu1 }
 0x184   :  { %v1751_v11 = vpop.f32.mrb[7].mxu1 }
 0x185   :  { %v1752_v41 = vadd.f32 %v1751_v11, %v1750_v57 }
 0x187   :  { %v678_v10 = vadd.f32 %v1752_v41, %v570_v48 }
 0x1a3   :  { %v1785_v37 = vpop.f32.mrb[8].mxu1 }
 0x1a4   :  { %v1786_v46 = vpop.f32.mrb[9].mxu1 }
 0x1a5   :  { %v1787_v35 = vadd.f32 %v1786_v46, %v1785_v37 }
 0x1a7   :  { %v846_v50 = vadd.f32 %v1787_v35, %v678_v10 }
 0x1c0   :  { %v1590_v51 = vpop.f32.mrb[0].mxu0 }
 0x1c1   :  { %v2134_v63 = vpop.f32.mrb[1].mxu0 }
 0x1c3   :  { %v1820_v62 = vpop.f32.mrb[10].mxu1 }
 0x1c4   :  { %v1821_v12 = vpop.f32.mrb[11].mxu1 }
 0x1c5   :  { %v1822_v28 = vadd.f32 %v1821_v12, %v1820_v62 }
 0x1c7   :  { %v950_v6 = vadd.f32 %v1822_v28, %v846_v50 }
 0x1c9   :  { %v2471_v4 = vadd.f32 %v1590_v51, %v950_v6 }
 0x1cb   :  { %v1594_v36 = vmax.f32 %v2471_v4, 0.0 }
 0x1cd   :  { %v1595_v14 = vmin.f32 %v1594_v36, 1.0 }
 0x1cf   :  { %v2482_v40 = vround.rtne.f32 %v1595_v14 }
 0x1d1   :  { %1597 = vst [vmem:[#allocation5] sm:$0x1] %v2482_v40 }
 0x1d2   :  { %2523 = shalt.err (!%p2520_p12)
}
 0x1d3   :  { %s2524_s29 = scalar_lea.hbm %s3329_s2, 16 }
 0x1d4   :  { %p2525_p13 = scmp.ne.s32.totalorder %s3329_s2, %s2524_s29  ;;  %p2528_p0 = scmp.lt.u32.totalorder %s2524_s29, %s3329_s2 }
 0x1d6   :  { %p2530_p1 = pnand %p2528_p0, %p2525_p13 }
 0x1d8   :  { %2533 = shalt.err (!%p2530_p1)
}
 0x1d9   :  { %1607 = dma.vmem_to_hbm [thread:$0]  %s1605_s24, 16, %s3329_s2, [#allocation4]  }
 0x1da   :  { %2536 = dma.done.wait [#allocation4], 16  }
 0x1db   :  { %2537 = vsyncadd [#allocation4], 4294967280 }
 0x1dc   :  { %1611 = vsyncpa [#allocation3], 1 }
 0x1dd   :  { %1612 = vsyncpa [#allocation4], 1 }

</bundles_post_ra>
